<compile_context>
chip_gen: v7x
topology: tpu7x:2x2x1
jax: 0.10.0
libtpu: 0.0.40
codegen_flags: <defaults>
</compile_context>

<pallas_src>
import functools

import jax
import jax.numpy as jnp
from jax.experimental import pallas as pl
from jax.experimental.pallas import tpu as pltpu

_LANE = 128
_ROW_WIDTH = 512                              # lane width of one logical "row"
_BUFFER_BUDGET_BYTES = 16 * 1024 * 1024       # 2 inputs x 2 pipeline buffers, total


def _bce_tile_kernel(att_ref, tgt_ref, out_ref, *, rows_per_sample, t_rows, n_tiles):
    """One grid step: BCE-with-logits over a (B, t_rows, ROW_WIDTH) tile,
    reduced to one lane-dense (1, B, 128) partial-sum block."""
    i = pl.program_id(0)

    x = att_ref[...].astype(jnp.float32)      # (B, t_rows, RW) logits
    y = tgt_ref[...].astype(jnp.float32)      # (B, t_rows, RW) targets in {0,1}

    # Stable BCEWithLogits: max(x,0) - x*y + log1p(exp(-|x|)).
    t = jnp.exp(-jnp.abs(x))
    softplus = jnp.where(t < 1e-6, t, jnp.log(1.0 + t))   # log1p-accurate
    bce = jnp.maximum(x, 0.0) - x * y + softplus

    # Fold the 512-wide lane axis down to 128 lanes with plain VALU adds
    # (128-aligned lane slices are layout-free; folds never mix rows).
    rw = bce.shape[-1]
    p = bce[..., 0:_LANE]
    for k in range(1, rw // _LANE):
        p = p + bce[..., k * _LANE:(k + 1) * _LANE]

    # Interior tiles are fully valid: unmasked cross-sublane reduce -> (1, B, 128).
    out_ref[...] = jnp.sum(p, axis=1)[None]

    # Only a ragged last tile can contain out-of-bounds (garbage) rows; mask and
    # rewrite the partial there. Compiled in only when raggedness is possible.
    if rows_per_sample % t_rows != 0:
        @pl.when(i == n_tiles - 1)
        def _():
            row = jax.lax.broadcasted_iota(jnp.int32, p.shape, dimension=1)
            limit = rows_per_sample - i * t_rows
            pm = jnp.where(row < limit, p, 0.0)
            out_ref[...] = jnp.sum(pm, axis=1)[None]


def text_region_attention_loss(attention_maps, text_region_masks, valid,
                               loss_weight=1.0, reduction="mean",
                               max_tile_rows=None):
    """
    Args:
      attention_maps:    (B, 1, H, W) attention logits (f32 or bf16).
      text_region_masks: (B, 1, H, W) binary text-region masks (built host-side
                         from objects_info / RLE decode / text matching).
      valid:             (B,) 1.0 where a text<->object match was found, else 0.0.
      max_tile_rows:     optional override of the row-tile size (testing only).
    Returns: scalar f32 loss = loss_weight * sum_i(valid_i*per_sample_i)/max(#valid,1)
    """
    if reduction not in ("mean", "sum"):
        # reduction='none' would return a non-scalar in the PyTorch module.
        raise ValueError(f"Unsupported reduction: {reduction!r} (use 'mean' or 'sum')")

    b, c, h, w = attention_maps.shape
    hw = c * h * w
    rw = _ROW_WIDTH
    rows = -(-hw // rw)
    hw_pad = rows * rw

    x = attention_maps.reshape(b, hw)         # free (contiguous) re-view
    y = text_region_masks.reshape(b, hw)
    if hw_pad != hw:
        # Minimal (<ROW_WIDTH per sample) tail pad so the row re-view is legal.
        # Pad values make BCE(pad) = log1p(exp(-30)) ~ 9e-14, i.e. effectively 0,
        # so no per-element validity mask is needed in the hot loop.
        x = jnp.pad(x, ((0, 0), (0, hw_pad - hw)), constant_values=30.0)
        y = jnp.pad(y, ((0, 0), (0, hw_pad - hw)), constant_values=1.0)
    x = x.reshape(b, rows, rw)                # free: row-major contiguous split
    y = y.reshape(b, rows, rw)

    itembytes = x.dtype.itemsize + y.dtype.itemsize
    budget_rows = _BUFFER_BUDGET_BYTES // (2 * itembytes * b * rw)  # 2 pipeline bufs
    if max_tile_rows is not None:
        budget_rows = min(budget_rows, int(max_tile_rows))
    if budget_rows >= rows:
        t_rows, n_tiles = rows, 1             # single tile; full-dim block is legal
    else:
        t_rows = max(8, (budget_rows // 8) * 8)
        n_tiles = -(-rows // t_rows)

    kernel = functools.partial(_bce_tile_kernel, rows_per_sample=rows,
                               t_rows=t_rows, n_tiles=n_tiles)

    grid_spec = pltpu.PrefetchScalarGridSpec(
        num_scalar_prefetch=0,
        grid=(n_tiles,),
        in_specs=[
            pl.BlockSpec((b, t_rows, rw), lambda i: (0, i, 0)),
            pl.BlockSpec((b, t_rows, rw), lambda i: (0, i, 0)),
        ],
        out_specs=pl.BlockSpec((1, b, _LANE), lambda i: (i, 0, 0)),
    )

    buffer_bytes = 2 * itembytes * b * t_rows * rw      # both inputs, both buffers
    vmem_limit = int(min(48 * 1024 * 1024,
                         max(32 * 1024 * 1024, buffer_bytes + 8 * 1024 * 1024)))

    elems = b * hw_pad
    cost = pl.CostEstimate(
        flops=8 * elems,
        transcendentals=2 * elems,
        bytes_accessed=elems * itembytes + n_tiles * b * _LANE * 4)

    partials = pl.pallas_call(
        kernel,
        out_shape=jax.ShapeDtypeStruct((n_tiles, b, _LANE), jnp.float32),
        grid_spec=grid_spec,
        compiler_params=pltpu.CompilerParams(
            dimension_semantics=("parallel",),
            vmem_limit_bytes=vmem_limit),
        cost_estimate=cost,
    )(x, y)

    # Tiny finalize outside the hot loop: combine tile/lane partials, apply
    # per-sample reduction, valid-mask, and average over matched samples.
    per_sample = jnp.sum(partials, axis=(0, 2))          # (B,)
    if reduction == "mean":
        per_sample = per_sample / jnp.float32(hw)
    v = valid.astype(jnp.float32)
    count = jnp.sum(v)
    loss = jnp.where(count > 0,
                     jnp.sum(per_sample * v) / jnp.maximum(count, 1.0),
                     jnp.float32(0.0))
    return jnp.float32(loss_weight) * loss


def _reference_loss(attention_maps, masks, valid, loss_weight=1.0, reduction="mean"):
    """Pure-JAX reference mirroring the PyTorch forward semantics."""
    b = attention_maps.shape[0]
    x = attention_maps.reshape(b, -1).astype(jnp.float32)
    y = masks.reshape(b, -1).astype(jnp.float32)
    bce = jnp.maximum(x, 0.0) - x * y + jnp.log1p(jnp.exp(-jnp.abs(x)))
    per = jnp.mean(bce, axis=-1) if reduction == "mean" else jnp.sum(bce, axis=-1)
    v = valid.astype(jnp.float32)
    cnt = jnp.sum(v)
    loss = jnp.where(cnt > 0, jnp.sum(per * v) / jnp.maximum(cnt, 1.0), 0.0)
    return jnp.float32(loss_weight) * loss


def _check(got, want, rtol=1e-5, atol=1e-5, tag=""):
    assert jnp.allclose(got, want, rtol=rtol, atol=atol), (tag, got, want)


if __name__ == "__main__":
    key = jax.random.PRNGKey(0)
    ks = jax.random.split(key, 10)

    B = 2
    att = jax.random.normal(ks[0], (B, 1, 16, 16), dtype=jnp.float32)
    # Synthetic "text region" masks (real ones come from host-side RLE decode +
    # category/synonym matching against the prompt).
    masks = (jax.random.uniform(ks[1], (B, 1, 16, 16)) > 0.5).astype(jnp.float32)
    valid_all = jnp.array([1.0, 1.0], dtype=jnp.float32)
    valid_partial = jnp.array([1.0, 0.0], dtype=jnp.float32)
    valid_none = jnp.array([0.0, 0.0], dtype=jnp.float32)

    # 1) mean reduction, all samples valid.
    loss = text_region_attention_loss(att, masks, valid_all, 1.0, "mean")
    jax.block_until_ready(loss)
    _check(loss, _reference_loss(att, masks, valid_all, 1.0, "mean"), tag="mean")

    # 2) sum reduction, one invalid sample, non-unit loss weight.
    loss2 = text_region_attention_loss(att, masks, valid_partial, 0.5, "sum")
    jax.block_until_ready(loss2)
    _check(loss2, _reference_loss(att, masks, valid_partial, 0.5, "sum"),
           atol=1e-4, tag="sum")

    # 3) non-aligned spatial size exercises the minimal tail-pad path.
    att3 = jax.random.normal(ks[2], (B, 1, 15, 15), dtype=jnp.float32)
    masks3 = (jax.random.uniform(ks[3], (B, 1, 15, 15)) > 0.5).astype(jnp.float32)
    loss3 = text_region_attention_loss(att3, masks3, valid_all, 1.0, "mean")
    jax.block_until_ready(loss3)
    _check(loss3, _reference_loss(att3, masks3, valid_all, 1.0, "mean"), tag="pad")

    # 4) bf16 attention logits in HBM (cast to f32 per-tile inside the kernel).
    att4 = att.astype(jnp.bfloat16)
    loss4 = text_region_attention_loss(att4, masks, valid_all, 1.0, "mean")
    jax.block_until_ready(loss4)
    _check(loss4, _reference_loss(att4, masks, valid_all, 1.0, "mean"), tag="bf16")

    # 5) 96x96 -> hw divisible by 512, single full-sublane tile, no padding.
    att5 = jax.random.normal(ks[4], (B, 1, 96, 96), dtype=jnp.float32)
    masks5 = (jax.random.uniform(ks[5], (B, 1, 96, 96)) > 0.5).astype(jnp.float32)
    loss5 = text_region_attention_loss(att5, masks5, valid_partial, 1.0, "mean")
    jax.block_until_ready(loss5)
    _check(loss5, _reference_loss(att5, masks5, valid_partial, 1.0, "mean"),
           tag="96x96")

    # 6) force small row tiles -> multi-tile grid with a ragged, masked last tile.
    loss6 = text_region_attention_loss(att5, masks5, valid_all, 1.0, "mean",
                                       max_tile_rows=8)
    jax.block_until_ready(loss6)
    _check(loss6, _reference_loss(att5, masks5, valid_all, 1.0, "mean"),
           tag="ragged-multitile")

    # 7) multi-tile grid with no ragged tile (rows divisible by tile rows).
    att7 = jax.random.normal(ks[6], (B, 1, 64, 128), dtype=jnp.float32)
    masks7 = (jax.random.uniform(ks[7], (B, 1, 64, 128)) > 0.5).astype(jnp.float32)
    loss7 = text_region_attention_loss(att7, masks7, valid_all, 1.0, "sum",
                                       max_tile_rows=8)
    jax.block_until_ready(loss7)
    _check(loss7, _reference_loss(att7, masks7, valid_all, 1.0, "sum"),
           atol=1e-3, tag="multitile-sum")

    # 8) no valid samples -> loss is exactly 0.
    loss8 = text_region_attention_loss(att, masks, valid_none, 1.0, "mean")
    jax.block_until_ready(loss8)
    _check(loss8, jnp.float32(0.0), tag="no-valid")

    print("KERNEL_OK")
</pallas_src>

<mosaic_0001>
module attributes {stable_mosaic.version = 11 : i64} {
  func.func @_bce_tile_kernel(%arg0: i32, %arg1: memref<2x1x512xf32, #tpu.memory_space<vmem>>, %arg2: memref<2x1x512xf32, #tpu.memory_space<vmem>>, %arg3: memref<1x2x128xf32, #tpu.memory_space<vmem>>) attributes {dimension_semantics = [#tpu.dimension_semantics<parallel>], iteration_bounds = array<i64: 1>, scalar_prefetch = 0 : i64, scratch_operands = 0 : i64, tpu.core_type = #tpu.core_type<tc>, window_params = [{transform_indices = @transform_0, window_bounds = array<i64: 2, 1, 512>}, {transform_indices = @transform_1, window_bounds = array<i64: 2, 1, 512>}, {transform_indices = @transform_2, window_bounds = array<i64: 1, 2, 128>}]} {
    %c0 = arith.constant 0 : index
    %c0_0 = arith.constant 0 : index
    %c0_1 = arith.constant 0 : index
    %0 = vector.load %arg1[%c0, %c0_0, %c0_1] : memref<2x1x512xf32, #tpu.memory_space<vmem>>, vector<2x1x512xf32>
    %c0_2 = arith.constant 0 : index
    %c0_3 = arith.constant 0 : index
    %c0_4 = arith.constant 0 : index
    %1 = vector.load %arg2[%c0_2, %c0_3, %c0_4] : memref<2x1x512xf32, #tpu.memory_space<vmem>>, vector<2x1x512xf32>
    %2 = math.absf %0 : vector<2x1x512xf32>
    %cst = arith.constant 0.000000e+00 : f32
    %3 = vector.broadcast %cst : f32 to vector<2x1x512xf32>
    %4 = arith.subf %3, %2 : vector<2x1x512xf32>
    %5 = math.exp %4 : vector<2x1x512xf32>
    %cst_5 = arith.constant 9.99999997E-7 : f32
    %6 = vector.broadcast %cst_5 : f32 to vector<2x1x512xf32>
    %7 = arith.cmpf olt, %5, %6 : vector<2x1x512xf32>
    %cst_6 = arith.constant 1.000000e+00 : f32
    %8 = vector.broadcast %cst_6 : f32 to vector<2x1x512xf32>
    %9 = arith.addf %8, %5 : vector<2x1x512xf32>
    %10 = math.log %9 : vector<2x1x512xf32>
    %11 = arith.select %7, %5, %10 : vector<2x1x512xi1>, vector<2x1x512xf32>
    %cst_7 = arith.constant 0.000000e+00 : f32
    %12 = vector.broadcast %cst_7 : f32 to vector<2x1x512xf32>
    %13 = arith.maximumf %0, %12 : vector<2x1x512xf32>
    %14 = arith.mulf %0, %1 : vector<2x1x512xf32>
    %15 = arith.subf %13, %14 : vector<2x1x512xf32>
    %16 = arith.addf %15, %11 : vector<2x1x512xf32>
    %17 = vector.extract_strided_slice %16 {offsets = [0, 0, 0], sizes = [2, 1, 128], strides = [1, 1, 1]} : vector<2x1x512xf32> to vector<2x1x128xf32>
    %18 = vector.extract_strided_slice %16 {offsets = [0, 0, 128], sizes = [2, 1, 128], strides = [1, 1, 1]} : vector<2x1x512xf32> to vector<2x1x128xf32>
    %19 = arith.addf %17, %18 : vector<2x1x128xf32>
    %20 = vector.extract_strided_slice %16 {offsets = [0, 0, 256], sizes = [2, 1, 128], strides = [1, 1, 1]} : vector<2x1x512xf32> to vector<2x1x128xf32>
    %21 = arith.addf %19, %20 : vector<2x1x128xf32>
    %22 = vector.extract_strided_slice %16 {offsets = [0, 0, 384], sizes = [2, 1, 128], strides = [1, 1, 1]} : vector<2x1x512xf32> to vector<2x1x128xf32>
    %23 = arith.addf %21, %22 : vector<2x1x128xf32>
    %cst_8 = arith.constant dense<0.000000e+00> : vector<2x128xf32>
    %24 = vector.multi_reduction <add>, %23, %cst_8 [1] : vector<2x1x128xf32> to vector<2x128xf32>
    %25 = vector.shape_cast %24 : vector<2x128xf32> to vector<1x2x128xf32>
    %c0_9 = arith.constant 0 : index
    %c0_10 = arith.constant 0 : index
    %c0_11 = arith.constant 0 : index
    %26 = vector.load %arg3[%c0_9, %c0_10, %c0_11] : memref<1x2x128xf32, #tpu.memory_space<vmem>>, vector<1x2x128xf32>
    tpu.vector_store %arg3[%c0_9, %c0_10, %c0_11], %25 {strides = array<i32>} : memref<1x2x128xf32, #tpu.memory_space<vmem>>, vector<1x2x128xf32>,
    return
  }
  func.func @transform_0(%arg0: i32) -> (i32, i32, i32) {
    %c0_i32 = arith.constant 0 : i32
    %c0_i32_0 = arith.constant 0 : i32
    %c0_i32_1 = arith.constant 0 : i32
    return %c0_i32, %arg0, %c0_i32_0 : i32, i32, i32
  }
  func.func @transform_1(%arg0: i32) -> (i32, i32, i32) {
    %c0_i32 = arith.constant 0 : i32
    %c0_i32_0 = arith.constant 0 : i32
    %c0_i32_1 = arith.constant 0 : i32
    return %c0_i32, %arg0, %c0_i32_0 : i32, i32, i32
  }
  func.func @transform_2(%arg0: i32) -> (i32, i32, i32) {
    %c0_i32 = arith.constant 0 : i32
    %c0_i32_0 = arith.constant 0 : i32
    %c0_i32_1 = arith.constant 0 : i32
    return %arg0, %c0_i32, %c0_i32_0 : i32, i32, i32
  }
}

</mosaic_0001>

<bundles_post_ra>
// kernel: tpu_custom_call.1
= control target key start
LH: loop header
LB: loop body
LE: loop exit
PB: predicated region body
PF: predicated region fallthrough
CT: control target
= control target key end

     0   :  { %7 = vsyncpa [#allocation3], 0  ;;  %s271_s0 = inlined_call_operand.hbm [shape: f32[2,1,512], index: 0, kind: input, shape index: {}]   ;;  %s272_s1 = inlined_call_operand.hbm [shape: f32[2,1,512], index: 1, kind: input, shape index: {}]   ;;  %s273_s2 = inlined_call_operand.hbm [shape: f32[1,2,128], index: 2, kind: output, shape index: {}]  }
   0x1   :  { %8 = vsyncpa [#allocation6], 0 }
   0x2   :  { %9 = vsyncpa [#allocation4], 0  ;;  %s214_s9 = smov [#allocation2]   ;;  %s142_s13 = scalar_lea.hbm %s271_s0, 128 }
   0x3   :  { %s15_s10 = sshll.u32 %s214_s9, 4  ;;  %p143_p0 = scmp.ne.s32.totalorder %s271_s0, %s142_s13  ;;  %s16_s10 = int_to_ptr.vmem [resolvable:$true] %s15_s10 }
   0x4   :  { %p146_p1 = scmp.lt.u32.totalorder %s142_s13, %s271_s0 }
   0x6   :  { %p148_p2 = pnand %p146_p1, %p143_p0 }
   0x8   :  { %151 = shalt.err (!%p148_p2)
}
   0x9   :  { %s152_s18 = scalar_lea.vmem %s16_s10, 128  ;;  %p157_p4 = scmp.lt.s32.totalorder %s16_s10, %s16_s10 }
   0xa   :  { %p153_p3 = scmp.ne.s32.totalorder %s16_s10, %s152_s18  ;;  %p158_p5 = scmp.lt.s32.totalorder %s152_s18, %s152_s18 }
   0xc   :  { %p159_p6 = por %p158_p5, %p157_p4 }
   0xe   :  { %p160_p7 = pnand %p159_p6, %p153_p3 }
  0x10   :  { %163 = shalt.err (!%p160_p7)
}
  0x11   :  { %s215_s19 = smov 64   ;;  %s216_s20 = smov 4  }
  0x12   :  { %21 = dma.hbm_to_vmem [thread:$0]  %s271_s0, 128, %s16_s10, [#allocation3], %s215_s19, %s215_s19, %s216_s20  }
  0x13   :  { %s217_s23 = smov [#allocation5]   ;;  %s164_s27 = scalar_lea.hbm %s272_s1, 128 }
  0x14   :  { %s27_s24 = sshll.u32 %s217_s23, 4  ;;  %p165_p8 = scmp.ne.s32.totalorder %s272_s1, %s164_s27  ;;  %s28_s24 = int_to_ptr.vmem [resolvable:$true] %s27_s24 }
  0x15   :  { %p168_p9 = scmp.lt.u32.totalorder %s164_s27, %s272_s1 }
  0x17   :  { %p170_p10 = pnand %p168_p9, %p165_p8 }
  0x19   :  { %173 = shalt.err (!%p170_p10)
}
  0x1a   :  { %s174_s4 = scalar_lea.vmem %s28_s24, 128  ;;  %p179_p12 = scmp.lt.s32.totalorder %s28_s24, %s28_s24 }
  0x1b   :  { %p175_p11 = scmp.ne.s32.totalorder %s28_s24, %s174_s4  ;;  %p180_p13 = scmp.lt.s32.totalorder %s174_s4, %s174_s4 }
  0x1d   :  { %p181_p0 = por %p180_p13, %p179_p12 }
  0x1f   :  { %p182_p1 = pnand %p181_p0, %p175_p11 }
  0x21   :  { %185 = shalt.err (!%p182_p1)
}
  0x22   :  { %33 = dma.hbm_to_vmem [thread:$0]  %s272_s1, 128, %s28_s24, [#allocation6], %s215_s19, %s215_s19, %s216_s20  }
  0x23   :  { %208 = dma.done.wait [#allocation3], 128  }
  0x24   :  { %209 = vsyncadd [#allocation3], 4294967168 }
  0x25   :  { %210 = dma.done.wait [#allocation6], 128  }
  0x26   :  { %211 = vsyncadd [#allocation6], 4294967168  ;;  %v40_v0 = vld [vmem:[#allocation2] sm:$0xf]  ;;  %v41_v1 = vld [vmem:[#allocation2 + $0x4] sm:$0xf]  ;;  %v98_v30 = vlaneseq }
  0x27   :  { %v44_v2 = vand.u32 2147483647, %v40_v0  ;;  %v45_v3 = vand.u32 2147483647, %v41_v1  ;;  %v42_v12 = vld [vmem:[#allocation5] sm:$0xf] }
  0x28   :  { %v43_v13 = vld [vmem:[#allocation5 + $0x4] sm:$0xf]  ;;  %v62_v14 = vmax.f32 %v40_v0, 0.0  ;;  %v64_v15 = vmul.f32 %v42_v12, %v40_v0  ;;  %v63_v16 = vmax.f32 %v41_v1, 0.0  ;;  %v218_v28 = vmov 1966171168  }
  0x29   :  { %v46_v4 = vsub.f32 0.0, %v44_v2  ;;  %v47_v5 = vsub.f32 0.0, %v45_v3  ;;  %v65_v17 = vmul.f32 %v43_v13, %v41_v1  ;;  %v96_v29 = vunpack.c.l.s4 %v218_v28  ;;  %s219_s1 = smov [#allocation7]  }
  0x2a   :  { %v66_v19 = vsub.f32 %v62_v14, %v64_v15  ;;  %v99_v40 = vshrl.u32 %v98_v30, 7  ;;  %s117_s6 = sshll.u32 %s219_s1, 4  ;;  %s118_s6 = int_to_ptr.vmem [resolvable:$true] %s117_s6 }
  0x2b   :  { %v48_v6 = vmul.f32 1.442695, %v46_v4  ;;  %v50_v7 = vmul.f32 1.442695, %v47_v5  ;;  %v67_v22 = vsub.f32 %v63_v16, %v65_v17  ;;  %v97_v39 = vunpack.c.0.s8 %v96_v29  ;;  %s186_s7 = scalar_lea.vmem %s118_s6, 32  ;;  %p191_p3 = scmp.lt.s32.totalorder %s118_s6, %s118_s6 }
  0x2c   :  { %p187_p2 = scmp.ne.s32.totalorder %s118_s6, %s186_s7  ;;  %p192_p4 = scmp.lt.s32.totalorder %s186_s7, %s186_s7 }
  0x2d   :  { %134 = vpow2.f32 %v48_v6  ;;  %v100_v45 = vsub.s32 %v97_v39, %v99_v40 }
  0x2e   :  { %136 = vpow2.f32 %v50_v7  ;;  %p193_p5 = por %p192_p4, %p191_p3 }
  0x30   :  { %p194_p6 = pnand %p193_p5, %p187_p2 }
  0x37   :  { %v135_v8 = vpop.eup %134 }
  0x38   :  { %v137_v9 = vpop.eup %136  ;;  %v54_v10 = vadd.f32 1.0, %v135_v8  ;;  %vm52_vm0 = vcmp.lt.f32.partialorder %v135_v8, 1e-06 }
  0x39   :  { %v55_v11 = vadd.f32 1.0, %v137_v9  ;;  %vm53_vm1 = vcmp.lt.f32.partialorder %v137_v9, 1e-06 }
  0x3a   :  { %138 = vlog2.f32 %v54_v10 }
  0x3b   :  { %140 = vlog2.f32 %v55_v11 }
  0x44   :  { %v139_v18 = vpop.eup %138 }
  0x45   :  { %v141_v20 = vpop.eup %140  ;;  %v57_v21 = vmul.f32 0.6931472, %v139_v18 }
  0x46   :  { %v59_v23 = vmul.f32 0.6931472, %v141_v20 }
  0x47   :  { %v60_v24 = vsel %vm52_vm0, %v135_v8, %v57_v21 }
  0x48   :  { %v61_v25 = vsel %vm53_vm1, %v137_v9, %v59_v23  ;;  %v68_v26 = vadd.f32 %v66_v19, %v60_v24 }
  0x49   :  { %v69_v27 = vadd.f32 %v67_v22, %v61_v25 }
  0x4a   :  { %v72_v31 = vrot.slane %v68_v26, 1  ;;  %v78_v32 = vrot.slane %v68_v26, 2  ;;  %v84_v36 = vrot.slane %v68_v26, 3 }
  0x4b   :  { %v73_v33 = vrot.slane %v69_v27, 1  ;;  %v79_v34 = vrot.slane %v69_v27, 2  ;;  %v85_v38 = vrot.slane %v69_v27, 3 }
  0x4c   :  { %v76_v35 = vadd.f32 %v72_v31, %v68_v26 }
  0x4d   :  { %v77_v37 = vadd.f32 %v73_v33, %v69_v27 }
  0x4e   :  { %v82_v41 = vadd.f32 %v78_v32, %v76_v35 }
  0x4f   :  { %v83_v42 = vadd.f32 %v79_v34, %v77_v37 }
  0x50   :  { %v88_v43 = vadd.f32 %v84_v36, %v82_v41 }
  0x51   :  { %v89_v44 = vadd.f32 %v85_v38, %v83_v42 }
  0x53   :  { %v94_v46 = vcombine.low %v88_v43, %v89_v44 }
  0x55   :  { %v101_v47 = vrot.slane %v94_v46, %v100_v45 }
  0x57   :  { %127 = vst.sshfl [vmem:[#allocation7] sm:$0x5 pattern:$0x73625140] %v101_v47 }
  0x58   :  { %197 = shalt.err (!%p194_p6)
}
  0x59   :  { %s198_s10 = scalar_lea.hbm %s273_s2, 32 }
  0x5a   :  { %p199_p7 = scmp.ne.s32.totalorder %s273_s2, %s198_s10  ;;  %p202_p8 = scmp.lt.u32.totalorder %s198_s10, %s273_s2 }
  0x5c   :  { %p204_p9 = pnand %p202_p8, %p199_p7 }
  0x5e   :  { %207 = shalt.err (!%p204_p9)
}
  0x5f   :  { %120 = dma.vmem_to_hbm [thread:$0]  %s118_s6, 32, %s273_s2, [#allocation4]  }
  0x60   :  { %212 = dma.done.wait [#allocation4], 32  }
  0x61   :  { %213 = vsyncadd [#allocation4], 4294967264 }
  0x62   :  { %124 = vsyncpa [#allocation3], 1 }
  0x63   :  { %125 = vsyncpa [#allocation6], 1 }
  0x64   :  { %126 = vsyncpa [#allocation4], 1 }

</bundles_post_ra>
